<compile_context>
chip_gen: v7x
topology: tpu7x:2x2x1
jax: 0.10.0
libtpu: 0.0.40
codegen_flags: <defaults>
</compile_context>

<pallas_src>
import functools
import math

import jax
import jax.numpy as jnp
from jax import lax
from jax.experimental import pallas as pl
from jax.experimental.pallas import tpu as pltpu

_LANE = 128      # vreg lane width
_SUBLANE = 8     # vreg sublane count (f32)
_MAX_TB = 256    # batch-tile rows: fills MXU M-dim, no f32 accumulator spill


def _round_up(x, m):
    return (x + m - 1) // m * m


def _fused_mlp_kernel(*refs, num_layers, output_dim, apply_softmax):
    """Entire MLP head for one batch tile in a single kernel.

    refs = (x_ref, w1, b1, w2, b2, ..., wn, bn, o_ref).  Weights are bf16
    (lane-padded to 128 output columns with zeros), biases/activations are f32.
    Intermediate activations never leave vregs/VMEM.
    """
    x_ref = refs[0]
    o_ref = refs[-1]
    p = refs[1:-1]

    h = x_ref[...].astype(jnp.float32)
    for i in range(num_layers):
        w = p[2 * i][...]                      # bf16 (in_p, out_p)
        b = p[2 * i + 1][...]                  # f32  (1, out_p)
        # bf16 MXU operands, f32 accumulation.
        h = jnp.dot(h.astype(jnp.bfloat16), w,
                    preferred_element_type=jnp.float32) + b
        if i != num_layers - 1:
            h = jnp.maximum(h, 0.0)            # ReLU on hidden layers only

    if apply_softmax:
        # Padded logit columns are exactly 0 (zero-padded weights/bias); mask
        # them to -inf so they don't contribute to the softmax denominator.
        cols = lax.broadcasted_iota(jnp.int32, h.shape, 1)
        h = jnp.where(cols < output_dim, h, -jnp.inf)
        m = jnp.max(h, axis=-1, keepdims=True)
        e = jnp.exp(h - m)                                  # EUP
        denom = jnp.sum(e, axis=-1, keepdims=True)          # XLU
        h = e * pl.reciprocal(denom, approx=True)           # EUP; padded -> 0

    o_ref[...] = h.astype(o_ref.dtype)


class SoftmaxMLP:
    """JAX/Pallas port of the PyTorch `Softmax` module (inference mode)."""

    def __init__(self, input_dim, hidden_dims, output_dim, dropout, key):
        # TODO(synk): dropout is a no-op here (eval-mode semantics); training-mode
        # stochastic dropout would use pltpu.prng_seed/prng_random_bits.
        del dropout
        self.input_dim = input_dim
        self.output_dim = output_dim

        # Unpadded f32 params (PyTorch-equivalent nn.Linear init).
        self.params = []
        d_in = input_dim
        for d_out in list(hidden_dims) + [output_dim]:
            key, kw, kb = jax.random.split(key, 3)
            bound = 1.0 / math.sqrt(d_in)  # U(-1/sqrt(fan_in), 1/sqrt(fan_in))
            w = jax.random.uniform(kw, (d_in, d_out), jnp.float32, -bound, bound)
            b = jax.random.uniform(kb, (d_out,), jnp.float32, -bound, bound)
            self.params.append((w, b))
            d_in = d_out

        # Lane-padded params, staged once (hoisted out of the per-call path).
        # Zero padding keeps padded output columns exactly 0 through ReLU.
        # Weights in bf16 (halves weight DMA + bf16-native MXU on v6e/v7x),
        # biases in f32 (added after the f32 accumulation).
        self._padded_params = []
        d_in_p = input_dim
        for (w, b) in self.params:
            d_out_p = _round_up(w.shape[1], _LANE)
            w_p = jnp.zeros((d_in_p, d_out_p), jnp.float32)
            w_p = w_p.at[: w.shape[0], : w.shape[1]].set(w)
            b_p = jnp.zeros((1, d_out_p), jnp.float32)
            b_p = b_p.at[0, : b.shape[0]].set(b)
            self._padded_params.append((w_p.astype(jnp.bfloat16), b_p))
            d_in_p = d_out_p
        self._out_pad = d_in_p

    # ---- fused forward / predict ------------------------------------------
    def _run(self, x, apply_softmax):
        B, D = x.shape
        assert D == self.input_dim
        TB = min(_MAX_TB, _round_up(B, _SUBLANE))
        grid = (pl.cdiv(B, TB),)

        flat_params = []
        in_specs = [pl.BlockSpec((TB, D), lambda i: (i, 0))]
        for (w, b) in self._padded_params:
            flat_params += [w, b]
            # Constant index_map -> params stay VMEM-resident across grid steps.
            in_specs += [
                pl.BlockSpec(w.shape, lambda i: (0, 0)),
                pl.BlockSpec(b.shape, lambda i: (0, 0)),
            ]

        kernel = functools.partial(
            _fused_mlp_kernel,
            num_layers=len(self._padded_params),
            output_dim=self.output_dim,
            apply_softmax=apply_softmax,
        )
        out = pl.pallas_call(
            kernel,
            out_shape=jax.ShapeDtypeStruct((B, self._out_pad), jnp.float32),
            grid=grid,
            in_specs=in_specs,
            out_specs=pl.BlockSpec((TB, self._out_pad), lambda i: (i, 0)),
            compiler_params=pltpu.CompilerParams(
                dimension_semantics=("parallel",)),
        )(x, *flat_params)
        return out[:, : self.output_dim]

    def forward(self, x):
        return self._run(x, apply_softmax=False)

    def predict(self, x):
        return self._run(x, apply_softmax=True)

    def predict_classes(self, x):
        # argmax(softmax(z)) == argmax(z): skip the softmax entirely.
        return jnp.argmax(self.forward(x), axis=1)


if __name__ == "__main__":
    key = jax.random.PRNGKey(0)
    k_model, k_x = jax.random.split(key)

    batch = 8
    input_dim = 32
    hidden_dims = (64, 48)
    output_dim = 10
    dropout = 0.1

    model = SoftmaxMLP(input_dim, hidden_dims, output_dim, dropout, k_model)
    x = jax.random.normal(k_x, (batch, input_dim), jnp.float32)

    logits = model.forward(x)
    jax.block_until_ready(logits)
    assert logits.shape == (batch, output_dim)

    # sanity: pure-JAX reference using the same bf16-operand / f32-accumulate
    # matmul recipe as the kernel.
    ref = x
    for i, (w, b) in enumerate(model.params):
        ref = jnp.dot(ref.astype(jnp.bfloat16), w.astype(jnp.bfloat16),
                      preferred_element_type=jnp.float32) + b
        if i != len(model.params) - 1:
            ref = jnp.maximum(ref, 0.0)
    assert jnp.allclose(logits, ref, atol=2e-3, rtol=2e-3)

    probs = model.predict(x)
    classes = model.predict_classes(x)
    jax.block_until_ready((probs, classes))
    ref_probs = jax.nn.softmax(ref, axis=1)
    assert jnp.allclose(probs, ref_probs, atol=5e-3, rtol=5e-3)
    assert jnp.all(classes == jnp.argmax(ref_probs, axis=1))

    print("KERNEL_OK")
</pallas_src>

<mosaic_0001>
module attributes {stable_mosaic.version = 11 : i64} {
  func.func @_fused_mlp_kernel(%arg0: i32, %arg1: memref<8x32xf32, #tpu.memory_space<vmem>>, %arg2: memref<32x128xbf16, #tpu.memory_space<vmem>>, %arg3: memref<1x128xf32, #tpu.memory_space<vmem>>, %arg4: memref<128x128xbf16, #tpu.memory_space<vmem>>, %arg5: memref<1x128xf32, #tpu.memory_space<vmem>>, %arg6: memref<128x128xbf16, #tpu.memory_space<vmem>>, %arg7: memref<1x128xf32, #tpu.memory_space<vmem>>, %arg8: memref<8x128xf32, #tpu.memory_space<vmem>>) attributes {dimension_semantics = [#tpu.dimension_semantics<parallel>], iteration_bounds = array<i64: 1>, scalar_prefetch = 0 : i64, scratch_operands = 0 : i64, tpu.core_type = #tpu.core_type<tc>, window_params = [{transform_indices = @transform_0, window_bounds = array<i64: 8, 32>}, {pipeline_mode = #tpu.pipeline_mode<synchronous>, transform_indices = @transform_1, window_bounds = array<i64: 32, 128>}, {pipeline_mode = #tpu.pipeline_mode<synchronous>, transform_indices = @transform_2, window_bounds = array<i64: 1, 128>}, {pipeline_mode = #tpu.pipeline_mode<synchronous>, transform_indices = @transform_3, window_bounds = array<i64: 128, 128>}, {pipeline_mode = #tpu.pipeline_mode<synchronous>, transform_indices = @transform_4, window_bounds = array<i64: 1, 128>}, {pipeline_mode = #tpu.pipeline_mode<synchronous>, transform_indices = @transform_5, window_bounds = array<i64: 128, 128>}, {pipeline_mode = #tpu.pipeline_mode<synchronous>, transform_indices = @transform_6, window_bounds = array<i64: 1, 128>}, {transform_indices = @transform_7, window_bounds = array<i64: 8, 128>}]} {
    %c0 = arith.constant 0 : index
    %c0_0 = arith.constant 0 : index
    %0 = vector.load %arg1[%c0, %c0_0] : memref<8x32xf32, #tpu.memory_space<vmem>>, vector<8x32xf32>
    %c0_1 = arith.constant 0 : index
    %c0_2 = arith.constant 0 : index
    %1 = vector.load %arg2[%c0_1, %c0_2] : memref<32x128xbf16, #tpu.memory_space<vmem>>, vector<32x128xbf16>
    %c0_3 = arith.constant 0 : index
    %c0_4 = arith.constant 0 : index
    %2 = vector.load %arg3[%c0_3, %c0_4] : memref<1x128xf32, #tpu.memory_space<vmem>>, vector<1x128xf32>
    %3 = arith.truncf %0 : vector<8x32xf32> to vector<8x32xbf16>
    %cst = arith.constant dense<0.000000e+00> : vector<8x128xf32>
    %4 = tpu.matmul %3, %1, %cst {dimension_numbers = #tpu.dot_dimension_numbers<[1], [0], [0], [1], [0, 0, 1, 1], [], []>} : vector<8x32xbf16>, vector<32x128xbf16>, vector<8x128xf32> -> vector<8x128xf32>
    %5 = vector.broadcast %2 : vector<1x128xf32> to vector<8x128xf32>
    %6 = arith.addf %4, %5 : vector<8x128xf32>
    %cst_5 = arith.constant 0.000000e+00 : f32
    %7 = vector.broadcast %cst_5 : f32 to vector<8x128xf32>
    %8 = arith.maximumf %6, %7 : vector<8x128xf32>
    %c0_6 = arith.constant 0 : index
    %c0_7 = arith.constant 0 : index
    %9 = vector.load %arg4[%c0_6, %c0_7] : memref<128x128xbf16, #tpu.memory_space<vmem>>, vector<128x128xbf16>
    %c0_8 = arith.constant 0 : index
    %c0_9 = arith.constant 0 : index
    %10 = vector.load %arg5[%c0_8, %c0_9] : memref<1x128xf32, #tpu.memory_space<vmem>>, vector<1x128xf32>
    %11 = arith.truncf %8 : vector<8x128xf32> to vector<8x128xbf16>
    %cst_10 = arith.constant dense<0.000000e+00> : vector<8x128xf32>
    %12 = tpu.matmul %11, %9, %cst_10 {dimension_numbers = #tpu.dot_dimension_numbers<[1], [0], [0], [1], [0, 0, 1, 1], [], []>} : vector<8x128xbf16>, vector<128x128xbf16>, vector<8x128xf32> -> vector<8x128xf32>
    %13 = vector.broadcast %10 : vector<1x128xf32> to vector<8x128xf32>
    %14 = arith.addf %12, %13 : vector<8x128xf32>
    %cst_11 = arith.constant 0.000000e+00 : f32
    %15 = vector.broadcast %cst_11 : f32 to vector<8x128xf32>
    %16 = arith.maximumf %14, %15 : vector<8x128xf32>
    %c0_12 = arith.constant 0 : index
    %c0_13 = arith.constant 0 : index
    %17 = vector.load %arg6[%c0_12, %c0_13] : memref<128x128xbf16, #tpu.memory_space<vmem>>, vector<128x128xbf16>
    %c0_14 = arith.constant 0 : index
    %c0_15 = arith.constant 0 : index
    %18 = vector.load %arg7[%c0_14, %c0_15] : memref<1x128xf32, #tpu.memory_space<vmem>>, vector<1x128xf32>
    %19 = arith.truncf %16 : vector<8x128xf32> to vector<8x128xbf16>
    %cst_16 = arith.constant dense<0.000000e+00> : vector<8x128xf32>
    %20 = tpu.matmul %19, %17, %cst_16 {dimension_numbers = #tpu.dot_dimension_numbers<[1], [0], [0], [1], [0, 0, 1, 1], [], []>} : vector<8x128xbf16>, vector<128x128xbf16>, vector<8x128xf32> -> vector<8x128xf32>
    %21 = vector.broadcast %18 : vector<1x128xf32> to vector<8x128xf32>
    %22 = arith.addf %20, %21 : vector<8x128xf32>
    %c0_17 = arith.constant 0 : index
    %c0_18 = arith.constant 0 : index
    %23 = vector.load %arg8[%c0_17, %c0_18] : memref<8x128xf32, #tpu.memory_space<vmem>>, vector<8x128xf32>
    tpu.vector_store %arg8[%c0_17, %c0_18], %22 {strides = array<i32>} : memref<8x128xf32, #tpu.memory_space<vmem>>, vector<8x128xf32>,
    return
  }
  func.func @transform_0(%arg0: i32) -> (i32, i32) {
    %c0_i32 = arith.constant 0 : i32
    %c0_i32_0 = arith.constant 0 : i32
    return %arg0, %c0_i32 : i32, i32
  }
  func.func @transform_1(%arg0: i32) -> (i32, i32) {
    %c0_i32 = arith.constant 0 : i32
    %c0_i32_0 = arith.constant 0 : i32
    %c0_i32_1 = arith.constant 0 : i32
    return %c0_i32, %c0_i32_0 : i32, i32
  }
  func.func @transform_2(%arg0: i32) -> (i32, i32) {
    %c0_i32 = arith.constant 0 : i32
    %c0_i32_0 = arith.constant 0 : i32
    %c0_i32_1 = arith.constant 0 : i32
    return %c0_i32, %c0_i32_0 : i32, i32
  }
  func.func @transform_3(%arg0: i32) -> (i32, i32) {
    %c0_i32 = arith.constant 0 : i32
    %c0_i32_0 = arith.constant 0 : i32
    %c0_i32_1 = arith.constant 0 : i32
    return %c0_i32, %c0_i32_0 : i32, i32
  }
  func.func @transform_4(%arg0: i32) -> (i32, i32) {
    %c0_i32 = arith.constant 0 : i32
    %c0_i32_0 = arith.constant 0 : i32
    %c0_i32_1 = arith.constant 0 : i32
    return %c0_i32, %c0_i32_0 : i32, i32
  }
  func.func @transform_5(%arg0: i32) -> (i32, i32) {
    %c0_i32 = arith.constant 0 : i32
    %c0_i32_0 = arith.constant 0 : i32
    %c0_i32_1 = arith.constant 0 : i32
    return %c0_i32, %c0_i32_0 : i32, i32
  }
  func.func @transform_6(%arg0: i32) -> (i32, i32) {
    %c0_i32 = arith.constant 0 : i32
    %c0_i32_0 = arith.constant 0 : i32
    %c0_i32_1 = arith.constant 0 : i32
    return %c0_i32, %c0_i32_0 : i32, i32
  }
  func.func @transform_7(%arg0: i32) -> (i32, i32) {
    %c0_i32 = arith.constant 0 : i32
    %c0_i32_0 = arith.constant 0 : i32
    return %arg0, %c0_i32 : i32, i32
  }
}

</mosaic_0001>

<bundles_post_ra>
// kernel: tpu_custom_call.1
= control target key start
LH: loop header
LB: loop body
LE: loop exit
PB: predicated region body
PF: predicated region fallthrough
CT: control target
= control target key end

     0   :  { %12 = vsyncpa [#allocation3], 0  ;;  %s781_s0 = inlined_call_operand.hbm [shape: f32[8,32], index: 0, kind: input, shape index: {}]   ;;  %s782_s1 = inlined_call_operand.hbm [shape: bf16[32,128], index: 1, kind: input, shape index: {}]   ;;  %s783_s2 = inlined_call_operand.vmem [shape: f32[1,128], index: 2, kind: input, shape index: {}]   ;;  %s784_s3 = inlined_call_operand.hbm [shape: bf16[128,128], index: 3, kind: input, shape index: {}]   ;;  %s785_s4 = inlined_call_operand.vmem [shape: f32[1,128], index: 4, kind: input, shape index: {}]   ;;  %s786_s5 = inlined_call_operand.hbm [shape: bf16[128,128], index: 5, kind: input, shape index: {}]   ;;  %s787_s6 = inlined_call_operand.vmem [shape: f32[1,128], index: 6, kind: input, shape index: {}]   ;;  %s788_s7 = inlined_call_operand.hbm [shape: f32[8,128], index: 7, kind: output, shape index: {}]  }
   0x1   :  { %13 = vsyncpa [#allocation6], 0 }
   0x2   :  { %14 = vsyncpa [#allocation9], 0 }
   0x3   :  { %15 = vsyncpa [#allocation4], 0  ;;  %s630_s24 = smov [#allocation5]   ;;  %s512_s28 = scalar_lea.hbm %s782_s1, 256 }
   0x4   :  { %s31_s25 = sshll.u32 %s630_s24, 4  ;;  %p513_p0 = scmp.ne.s32.totalorder %s782_s1, %s512_s28  ;;  %s32_s25 = int_to_ptr.vmem [resolvable:$true] %s31_s25 }
   0x5   :  { %p516_p1 = scmp.lt.u32.totalorder %s512_s28, %s782_s1 }
   0x7   :  { %p518_p2 = pnand %p516_p1, %p513_p0 }
   0x9   :  { %521 = shalt.err (!%p518_p2)
}
   0xa   :  { %s522_s10 = scalar_lea.vmem %s32_s25, 256  ;;  %p527_p4 = scmp.lt.s32.totalorder %s32_s25, %s32_s25 }
   0xb   :  { %p523_p3 = scmp.ne.s32.totalorder %s32_s25, %s522_s10  ;;  %p528_p5 = scmp.lt.s32.totalorder %s522_s10, %s522_s10 }
   0xd   :  { %p529_p6 = por %p528_p5, %p527_p4 }
   0xf   :  { %p530_p7 = pnand %p529_p6, %p523_p3 }
  0x11   :  { %533 = shalt.err (!%p530_p7)
}
  0x12   :  { %s631_s11 = smov 64   ;;  %s632_s12 = smov 4  }
  0x13   :  { %37 = dma.hbm_to_vmem [thread:$0]  %s782_s1, 256, %s32_s25, [#allocation6], %s631_s11, %s631_s11, %s632_s12  }
  0x14   :  { %s633_s15 = smov [#allocation2]   ;;  %s634_s17 = smov [#allocation7]  }
  0x15   :  { %s22_s16 = sshll.u32 %s633_s15, 4  ;;  %s45_s18 = sshll.u32 %s634_s17, 4  ;;  %s23_s16 = int_to_ptr.vmem [resolvable:$true] %s22_s16  ;;  %s46_s18 = int_to_ptr.vmem [resolvable:$true] %s45_s18 }
  0x16   :  { %s534_s21 = scalar_lea.hbm %s781_s0, 128 }
  0x17   :  { %p535_p8 = scmp.ne.s32.totalorder %s781_s0, %s534_s21  ;;  %p538_p9 = scmp.lt.u32.totalorder %s534_s21, %s781_s0 }
  0x19   :  { %p540_p10 = pnand %p538_p9, %p535_p8 }
  0x1b   :  { %543 = shalt.err (!%p540_p10)
}
  0x1c   :  { %s544_s1 = scalar_lea.vmem %s23_s16, 128  ;;  %p549_p12 = scmp.lt.s32.totalorder %s23_s16, %s23_s16 }
  0x1d   :  { %p545_p11 = scmp.ne.s32.totalorder %s23_s16, %s544_s1  ;;  %p550_p13 = scmp.lt.s32.totalorder %s544_s1, %s544_s1 }
  0x1f   :  { %p551_p0 = por %p550_p13, %p549_p12 }
  0x21   :  { %p552_p1 = pnand %p551_p0, %p545_p11 }
  0x23   :  { %555 = shalt.err (!%p552_p1)
}
  0x24   :  { %25 = dma.hbm_to_vmem [thread:$0]  %s781_s0, 128, %s23_s16, [#allocation3]  }
  0x25   :  { %s556_s30 = scalar_lea.hbm %s784_s3, 1024 }
  0x26   :  { %p557_p2 = scmp.ne.s32.totalorder %s784_s3, %s556_s30  ;;  %p560_p3 = scmp.lt.u32.totalorder %s556_s30, %s784_s3 }
  0x28   :  { %p562_p4 = pnand %p560_p3, %p557_p2 }
  0x2a   :  { %565 = shalt.err (!%p562_p4)
}
  0x2b   :  { %s566_s14 = scalar_lea.vmem %s46_s18, 1024  ;;  %p571_p6 = scmp.lt.s32.totalorder %s46_s18, %s46_s18 }
  0x2c   :  { %p567_p5 = scmp.ne.s32.totalorder %s46_s18, %s566_s14  ;;  %p572_p7 = scmp.lt.s32.totalorder %s566_s14, %s566_s14 }
  0x2e   :  { %p573_p8 = por %p572_p7, %p571_p6 }
  0x30   :  { %p574_p9 = pnand %p573_p8, %p567_p5 }
  0x32   :  { %577 = shalt.err (!%p574_p9)
}
  0x33   :  { %51 = dma.hbm_to_vmem [thread:$0]  %s784_s3, 1024, %s46_s18, [#allocation6], %s631_s11, %s631_s11, %s632_s12  }
  0x34   :  { %s635_s16 = smov [#allocation8]   ;;  %s578_s21 = scalar_lea.hbm %s786_s5, 1024 }
  0x35   :  { %s59_s17 = sshll.u32 %s635_s16, 4  ;;  %p579_p10 = scmp.ne.s32.totalorder %s786_s5, %s578_s21  ;;  %s60_s17 = int_to_ptr.vmem [resolvable:$true] %s59_s17 }
  0x36   :  { %p582_p11 = scmp.lt.u32.totalorder %s578_s21, %s786_s5 }
  0x38   :  { %p584_p12 = pnand %p582_p11, %p579_p10 }
  0x3a   :  { %587 = shalt.err (!%p584_p12)
}
  0x3b   :  { %s588_s1 = scalar_lea.vmem %s60_s17, 1024  ;;  %p593_p0 = scmp.lt.s32.totalorder %s60_s17, %s60_s17 }
  0x3c   :  { %p589_p13 = scmp.ne.s32.totalorder %s60_s17, %s588_s1  ;;  %p594_p1 = scmp.lt.s32.totalorder %s588_s1, %s588_s1 }
  0x3e   :  { %p595_p2 = por %p594_p1, %p593_p0 }
  0x40   :  { %p596_p3 = pnand %p595_p2, %p589_p13 }
  0x42   :  { %599 = shalt.err (!%p596_p3)
}
  0x43   :  { %65 = dma.hbm_to_vmem [thread:$0]  %s786_s5, 1024, %s60_s17, [#allocation9], %s631_s11, %s631_s11, %s632_s12  }
  0x44   :  { %622 = dma.done.wait [#allocation3], 128  }
  0x45   :  { %623 = vsyncadd [#allocation3], 4294967168 }
  0x46   :  { %624 = dma.done.wait [#allocation6], 1280  }
  0x47   :  { %625 = vsyncadd [#allocation6], 4294966016 }
  0x48   :  { %626 = dma.done.wait [#allocation9], 1024  }
  0x49   :  { %627 = vsyncadd [#allocation9], 4294966272  ;;  %v636_v0 = vmov 0.0   ;;  %vm637_vm0 = vmmov 0   ;;  %v494_v1 = vld [vmem:[#allocation5] sm:$0xff]   ;;  %v495_v2 = vld [vmem:[#allocation5 + $0x8] sm:$0xff]  }
  0x4a   :  { %437 = vmatprep.subr.bf16.mxu0 %v636_v0  ;;  %441 = vmatprep.mubr.msk.bf16.mxu0 %vm637_vm0, %v636_v0  ;;  %v81_v3 = vld [vmem:[#allocation2] sm:$0xff]  ;;  %v496_v4 = vld [vmem:[#allocation7] sm:$0xff]   ;;  %vm106_vm1 = vcmask 261120   ;;  %v498_v7 = vld [vmem:[#allocation7 + $0x10] sm:$0xff]   ;;  %s638_s28 = smov [#allocation10]  }
  0x4b   :  { %445 = vmatprep.subr.bf16.mxu1 %v636_v0  ;;  %461 = vmatprep.mubr.msk.bf16.mxu1 %vm637_vm0, %v636_v0  ;;  %v87_v5 = vpack.c.bf16 %v81_v3, %v81_v3  ;;  %v497_v6 = vld [vmem:[#allocation7 + $0x8] sm:$0xff]   ;;  %v499_v8 = vld [vmem:[#allocation7 + $0x18] sm:$0xff]   ;;  %v500_v9 = vld [vmem:[#allocation7 + $0x20] sm:$0xff]   ;;  %s383_s29 = sshll.u32 %s638_s28, 4  ;;  %s384_s29 = int_to_ptr.vmem [resolvable:$true] %s383_s29 }
  0x4c   :  { %438 = vmatpush3.bf16.msra.mxu0 %v494_v1  ;;  %446 = vmatpush3.bf16.msra.mxu1 %v496_v4  ;;  %v501_v10 = vld [vmem:[#allocation7 + $0x28] sm:$0xff]   ;;  %v502_v11 = vld [vmem:[#allocation7 + $0x30] sm:$0xff]   ;;  %v503_v12 = vld [vmem:[#allocation7 + $0x38] sm:$0xff]   ;;  %p605_p5 = scmp.lt.s32.totalorder %s384_s29, %s384_s29 }
  0x4d   :  { %439 = vmatprep.subr.bf16.mxu0 %v636_v0  ;;  %447 = vmatprep.subr.bf16.mxu1 %v636_v0  ;;  %v504_v13 = vld [vmem:[#allocation8] sm:$0xff]   ;;  %v505_v14 = vld [vmem:[#allocation8 + $0x8] sm:$0xff]   ;;  %v506_v15 = vld [vmem:[#allocation8 + $0x10] sm:$0xff]  }
  0x4e   :  { %v507_v16 = vld [vmem:[#allocation8 + $0x18] sm:$0xff]   ;;  %v508_v17 = vld [vmem:[#allocation8 + $0x20] sm:$0xff]   ;;  %v509_v18 = vld [vmem:[#allocation8 + $0x28] sm:$0xff]  }
  0x4f   :  { %v394_v19 = vld [vmem:[%s783_s2] ss:$0 sm:$0xff]  ;;  %v510_v27 = vld [vmem:[#allocation8 + $0x30] sm:$0xff]   ;;  %v511_v28 = vld [vmem:[#allocation8 + $0x38] sm:$0xff]  }
  0x50   :  { %440 = vmatpush3.bf16.msra.mxu0 %v495_v2  ;;  %448 = vmatpush3.bf16.msra.mxu1 %v497_v6  ;;  %v398_v29 = vld [vmem:[%s785_s4] ss:$0 sm:$0xff]  ;;  %s600_s4 = scalar_lea.vmem %s384_s29, 128 }
  0x51   :  { %465 = vmatprep.subr.bf16.mxu0 %v636_v0  ;;  %449 = vmatprep.subr.bf16.mxu1 %v636_v0  ;;  %v407_v37 = vld [vmem:[%s787_s6] ss:$0 sm:$0xff]  ;;  %p601_p4 = scmp.ne.s32.totalorder %s384_s29, %s600_s4  ;;  %p606_p6 = scmp.lt.s32.totalorder %s600_s4, %s600_s4 }
  0x53   :  { %442 = vmatmul.mubr.msk.bf16.vlgmr.msra.gmra.mrb[0].mxu0 %vm106_vm1, %v87_v5  ;;  %p607_p7 = por %p606_p6, %p605_p5 }
  0x54   :  { %481 = vmatprep.mubr.msk.bf16.mxu0 %vm637_vm0, %v636_v0  ;;  %450 = vmatpush3.bf16.msra.mxu1 %v498_v7 }
  0x55   :  { %451 = vmatprep.subr.bf16.mxu1 %v636_v0  ;;  %466 = vmatpush3.bf16.msra.mxu0 %v504_v13  ;;  %p608_p8 = pnand %p607_p7, %p601_p4 }
  0x56   :  { %467 = vmatprep.subr.bf16.mxu0 %v636_v0 }
  0x58   :  { %452 = vmatpush3.bf16.msra.mxu1 %v499_v8 }
  0x59   :  { %453 = vmatprep.subr.bf16.mxu1 %v636_v0  ;;  %468 = vmatpush3.bf16.msra.mxu0 %v505_v14 }
  0x5a   :  { %469 = vmatprep.subr.bf16.mxu0 %v636_v0 }
  0x5c   :  { %454 = vmatpush3.bf16.msra.mxu1 %v500_v9 }
  0x5d   :  { %455 = vmatprep.subr.bf16.mxu1 %v636_v0  ;;  %470 = vmatpush3.bf16.msra.mxu0 %v506_v15 }
  0x5e   :  { %471 = vmatprep.subr.bf16.mxu0 %v636_v0 }
  0x60   :  { %456 = vmatpush3.bf16.msra.mxu1 %v501_v10 }
  0x61   :  { %457 = vmatprep.subr.bf16.mxu1 %v636_v0  ;;  %472 = vmatpush3.bf16.msra.mxu0 %v507_v16 }
  0x62   :  { %473 = vmatprep.subr.bf16.mxu0 %v636_v0 }
  0x64   :  { %458 = vmatpush3.bf16.msra.mxu1 %v502_v11 }
  0x65   :  { %459 = vmatprep.subr.bf16.mxu1 %v636_v0  ;;  %474 = vmatpush3.bf16.msra.mxu0 %v508_v17 }
  0x66   :  { %475 = vmatprep.subr.bf16.mxu0 %v636_v0 }
  0x68   :  { %460 = vmatpush3.bf16.msra.mxu1 %v503_v12 }
  0x69   :  { %476 = vmatpush3.bf16.msra.mxu0 %v509_v18 }
  0x6a   :  { %477 = vmatprep.subr.bf16.mxu0 %v636_v0 }
  0x6d   :  { %478 = vmatpush3.bf16.msra.mxu0 %v510_v27 }
  0x6e   :  { %479 = vmatprep.subr.bf16.mxu0 %v636_v0 }
  0x71   :  { %480 = vmatpush3.bf16.msra.mxu0 %v511_v28 }
 0x126   :  { %v144_v20 = vpop.f32.mrb[0].mxu0 }
 0x127   :  { %v145_v21 = vadd.f32 %v394_v19, %v144_v20  ;;  %v443_v22 = vpop.f32.mrb[1].mxu0 }
 0x128   :  { %v147_v23 = vpop.f32.mrb[2].mxu0 }
 0x129   :  { %v150_v24 = vmax.f32 %v145_v21, 0.0  ;;  %v444_v25 = vpop.f32.mrb[3].mxu0 }
 0x12b   :  { %v168_v26 = vpack.c.bf16 %v150_v24, %v150_v24 }
 0x12d   :  { %462 = vmatmul.mubr.bf16.vlgmr.msra.gmra.mrb[0].mxu1 %v168_v26 }
 0x200   :  { %v257_v30 = vpop.f32.mrb[0].mxu1 }
 0x201   :  { %v258_v31 = vadd.f32 %v398_v29, %v257_v30  ;;  %v463_v32 = vpop.f32.mrb[1].mxu1 }
 0x202   :  { %v260_v33 = vpop.f32.mrb[2].mxu1 }
 0x203   :  { %v263_v34 = vmax.f32 %v258_v31, 0.0  ;;  %v464_v35 = vpop.f32.mrb[3].mxu1 }
 0x205   :  { %v281_v36 = vpack.c.bf16 %v263_v34, %v263_v34 }
 0x207   :  { %482 = vmatmul.mubr.bf16.vlgmr.msra.gmra.mrb[4].mxu0 %v281_v36 }
 0x2da   :  { %v370_v38 = vpop.f32.mrb[4].mxu0 }
 0x2db   :  { %v371_v39 = vadd.f32 %v407_v37, %v370_v38  ;;  %v483_v40 = vpop.f32.mrb[5].mxu0 }
 0x2dc   :  { %v373_v41 = vpop.f32.mrb[6].mxu0 }
 0x2dd   :  { %376 = vst [vmem:[#allocation10] sm:$0xff] %v371_v39  ;;  %v484_v42 = vpop.f32.mrb[7].mxu0 }
 0x2de   :  { %611 = shalt.err (!%p608_p8)
}
 0x2df   :  { %s612_s6 = scalar_lea.hbm %s788_s7, 128 }
 0x2e0   :  { %p613_p9 = scmp.ne.s32.totalorder %s788_s7, %s612_s6  ;;  %p616_p10 = scmp.lt.u32.totalorder %s612_s6, %s788_s7 }
 0x2e2   :  { %p618_p11 = pnand %p616_p10, %p613_p9 }
 0x2e4   :  { %621 = shalt.err (!%p618_p11)
}
 0x2e5   :  { %386 = dma.vmem_to_hbm [thread:$0]  %s384_s29, 128, %s788_s7, [#allocation4]  }
 0x2e6   :  { %628 = dma.done.wait [#allocation4], 128  }
 0x2e7   :  { %629 = vsyncadd [#allocation4], 4294967168 }
 0x2e8   :  { %390 = vsyncpa [#allocation3], 1 }
 0x2e9   :  { %391 = vsyncpa [#allocation6], 1 }
 0x2ea   :  { %392 = vsyncpa [#allocation9], 1 }
 0x2eb   :  { %393 = vsyncpa [#allocation4], 1 }

</bundles_post_ra>
